<compile_context>
chip_gen: v7x
topology: tpu7x:2x2x1
jax: 0.10.0
libtpu: 0.0.40
codegen_flags: <defaults>
</compile_context>

<pallas_src>
import functools

import jax
import jax.numpy as jnp
from jax.experimental import pallas as pl
from jax.experimental.pallas import tpu as pltpu


def _round_up(n, m):
    return ((n + m - 1) // m) * m


def _weight_row_offsets(channel_list):
    """Row offset of each layer's weight inside the packed bf16 weight slab.

    Offsets are rounded up to multiples of 16 rows so every in-kernel slice
    start is aligned to a packed-bf16 sublane tile."""
    offs, row = [], 0
    for cin in channel_list[:-1]:
        offs.append(row)
        row += _round_up(cin, 16)
    return tuple(offs), row


# ----------------------------------------------------------------------------
# Fused Pallas kernel: the entire MLP forward in one kernel body
# ----------------------------------------------------------------------------
def _fused_mlp_kernel(channel_list, relu_first, w_offs,
                      x_ref, w_ref, v_ref, o_ref):
    num_layers = len(channel_list) - 1

    def linear(x, i):
        cin, cout = channel_list[i], channel_list[i + 1]
        r0 = w_offs[i]
        w = w_ref[r0:r0 + cin, :cout]            # bf16 weight, static slice
        b = v_ref[i:i + 1, :cout]                # f32 bias row (1, cout)
        y = jnp.dot(x.astype(jnp.bfloat16), w,
                    preferred_element_type=jnp.float32)
        return y + b

    x = x_ref[...].astype(jnp.float32)
    # x = self.lins[0](x)
    x = linear(x, 0)

    for i in range(1, num_layers):
        c = channel_list[i]
        if relu_first:
            x = jnp.maximum(x, 0.0)
        # BatchNorm1d(track_running_stats=False): batch stats, biased var,
        # eps=1e-5, affine.  Two-pass variance, all statistics in f32.
        mean = jnp.mean(x, axis=0, keepdims=True)
        d = x - mean
        var = jnp.mean(d * d, axis=0, keepdims=True)
        gamma = v_ref[num_layers + (i - 1):num_layers + i, :c]
        beta = v_ref[2 * num_layers - 1 + (i - 1):2 * num_layers + i - 1, :c]
        x = d * jax.lax.rsqrt(var + 1e-5) * gamma + beta
        if not relu_first:
            x = jnp.maximum(x, 0.0)
        # dropout p=0.0 (module default) -> identity.
        x = linear(x, i)

    o_ref[...] = x.astype(o_ref.dtype)


# ----------------------------------------------------------------------------
# Parameter init (PyTorch-shaped) + one-time packing into two slabs
# ----------------------------------------------------------------------------
def init_mlp_params(key, channel_list):
    params = {"lins": [], "norms": []}
    for cin, cout in zip(channel_list[:-1], channel_list[1:]):
        key, kw, kb = jax.random.split(key, 3)
        # Kaiming-uniform-ish deterministic init (bound = 1/sqrt(fan_in))
        bound = 1.0 / jnp.sqrt(jnp.float32(cin))
        w = jax.random.uniform(kw, (cin, cout), jnp.float32, -bound, bound)
        b = jax.random.uniform(kb, (cout,), jnp.float32, -bound, bound)
        params["lins"].append((w, b))
    for c in channel_list[1:-1]:
        # BatchNorm1d.reset_parameters(): weight=1, bias=0
        params["norms"].append((jnp.ones((c,), jnp.float32),
                                jnp.zeros((c,), jnp.float32)))
    return params


def pack_params(params, channel_list):
    """One-time packing: bf16 weight slab + f32 vector slab (biases/gamma/beta).

    Weights keep their logical (unpadded) shapes; packing reduces the number
    of per-forward input DMAs from 2L + 2(L-1) + 1 to 3."""
    num_layers = len(channel_list) - 1
    max_c = max(channel_list[1:])
    w_offs, total_rows = _weight_row_offsets(channel_list)

    w_slab = jnp.zeros((total_rows, max_c), jnp.bfloat16)
    for i, (w, _) in enumerate(params["lins"]):
        cin, cout = w.shape
        w_slab = w_slab.at[w_offs[i]:w_offs[i] + cin, :cout].set(
            w.astype(jnp.bfloat16))

    # Rows 0..L-1: biases; L..2L-2: gammas; 2L-1..3L-3: betas.
    v_slab = jnp.zeros((3 * num_layers - 2, max_c), jnp.float32)
    for i, (_, b) in enumerate(params["lins"]):
        v_slab = v_slab.at[i, :b.shape[0]].set(b)
    for i, (g, beta) in enumerate(params["norms"]):
        v_slab = v_slab.at[num_layers + i, :g.shape[0]].set(g)
        v_slab = v_slab.at[2 * num_layers - 1 + i, :beta.shape[0]].set(beta)
    return {"w_slab": w_slab, "v_slab": v_slab}


# ----------------------------------------------------------------------------
# Wrapper: one pallas_call for the whole forward pass (no pad / slice around)
# ----------------------------------------------------------------------------
def mlp_forward(packed, x, channel_list, relu_first=False):
    n = x.shape[0]
    cout = channel_list[-1]
    w_offs, _ = _weight_row_offsets(channel_list)
    kernel = functools.partial(_fused_mlp_kernel, tuple(channel_list),
                               relu_first, w_offs)
    return pl.pallas_call(
        kernel,
        out_shape=jax.ShapeDtypeStruct((n, cout), x.dtype),
        in_specs=[pl.BlockSpec(memory_space=pltpu.MemorySpace.VMEM)] * 3,
        out_specs=pl.BlockSpec(memory_space=pltpu.MemorySpace.VMEM),
    )(x, packed["w_slab"], packed["v_slab"])


# ----------------------------------------------------------------------------
# Reference (pure JAX, unpacked params, same bf16-dot / f32-stat recipe)
# ----------------------------------------------------------------------------
def mlp_reference(params, x, relu_first=False):
    def linear(x, w, b):
        return jnp.dot(x.astype(jnp.bfloat16), w.astype(jnp.bfloat16),
                       preferred_element_type=jnp.float32) + b

    w0, b0 = params["lins"][0]
    x = linear(x, w0, b0)
    for (w, b), (g, beta) in zip(params["lins"][1:], params["norms"]):
        if relu_first:
            x = jnp.maximum(x, 0.0)
        mean = jnp.mean(x, axis=0, keepdims=True)
        var = jnp.mean((x - mean) ** 2, axis=0, keepdims=True)
        x = (x - mean) * jax.lax.rsqrt(var + 1e-5) * g + beta
        if not relu_first:
            x = jnp.maximum(x, 0.0)
        x = linear(x, w, b)
    return x


if __name__ == "__main__":
    channel_list = [16, 32, 32, 8]   # 3-layer MLP
    batch = 8

    key = jax.random.PRNGKey(0)
    kp, kx = jax.random.split(key)
    params = init_mlp_params(kp, channel_list)
    packed = pack_params(params, channel_list)          # one-time packing
    x = jax.random.normal(kx, (batch, channel_list[0]), jnp.float32)

    fwd = jax.jit(lambda p, xx: mlp_forward(p, xx, channel_list))
    out = jax.block_until_ready(fwd(packed, x))

    ref = mlp_reference(params, x)
    assert out.shape == (batch, channel_list[-1])
    assert jnp.allclose(out, ref, atol=1e-4, rtol=1e-4), "mismatch vs reference"

    print("KERNEL_OK")
</pallas_src>

<mosaic_0001>
module attributes {stable_mosaic.version = 11 : i64} {
  func.func @_fused_mlp_kernel(%arg0: memref<8x16xf32, #tpu.memory_space<vmem>>, %arg1: memref<80x32xbf16, #tpu.memory_space<vmem>>, %arg2: memref<7x32xf32, #tpu.memory_space<vmem>>, %arg3: memref<8x8xf32, #tpu.memory_space<vmem>>) attributes {dimension_semantics = [], scalar_prefetch = 0 : i64, scratch_operands = 0 : i64, tpu.core_type = #tpu.core_type<tc>} {
    %c0 = arith.constant 0 : index
    %c0_0 = arith.constant 0 : index
    %0 = vector.load %arg0[%c0, %c0_0] : memref<8x16xf32, #tpu.memory_space<vmem>>, vector<8x16xf32>
    %c0_1 = arith.constant 0 : index
    %c0_2 = arith.constant 0 : index
    %1 = vector.load %arg1[%c0_1, %c0_2] : memref<80x32xbf16, #tpu.memory_space<vmem>>, vector<16x32xbf16>
    %c0_3 = arith.constant 0 : index
    %c0_4 = arith.constant 0 : index
    %2 = vector.load %arg2[%c0_3, %c0_4] : memref<7x32xf32, #tpu.memory_space<vmem>>, vector<1x32xf32>
    %3 = arith.truncf %0 : vector<8x16xf32> to vector<8x16xbf16>
    %cst = arith.constant dense<0.000000e+00> : vector<8x32xf32>
    %4 = tpu.matmul %3, %1, %cst {dimension_numbers = #tpu.dot_dimension_numbers<[1], [0], [0], [1], [0, 0, 1, 1], [], []>} : vector<8x16xbf16>, vector<16x32xbf16>, vector<8x32xf32> -> vector<8x32xf32>
    %5 = vector.broadcast %2 : vector<1x32xf32> to vector<8x32xf32>
    %6 = arith.addf %4, %5 : vector<8x32xf32>
    %cst_5 = arith.constant dense<0.000000e+00> : vector<32xf32>
    %7 = vector.multi_reduction <add>, %6, %cst_5 [0] : vector<8x32xf32> to vector<32xf32>
    %8 = vector.shape_cast %7 : vector<32xf32> to vector<1x32xf32>
    %cst_6 = arith.constant 8.000000e+00 : f32
    %9 = vector.broadcast %cst_6 : f32 to vector<1x32xf32>
    %10 = arith.divf %8, %9 : vector<1x32xf32>
    %11 = vector.broadcast %10 : vector<1x32xf32> to vector<8x32xf32>
    %12 = arith.subf %6, %11 : vector<8x32xf32>
    %13 = arith.mulf %12, %12 : vector<8x32xf32>
    %cst_7 = arith.constant dense<0.000000e+00> : vector<32xf32>
    %14 = vector.multi_reduction <add>, %13, %cst_7 [0] : vector<8x32xf32> to vector<32xf32>
    %15 = vector.shape_cast %14 : vector<32xf32> to vector<1x32xf32>
    %cst_8 = arith.constant 8.000000e+00 : f32
    %16 = vector.broadcast %cst_8 : f32 to vector<1x32xf32>
    %17 = arith.divf %15, %16 : vector<1x32xf32>
    %c3 = arith.constant 3 : index
    %c0_9 = arith.constant 0 : index
    %18 = vector.load %arg2[%c3, %c0_9] : memref<7x32xf32, #tpu.memory_space<vmem>>, vector<1x32xf32>
    %c5 = arith.constant 5 : index
    %c0_10 = arith.constant 0 : index
    %19 = vector.load %arg2[%c5, %c0_10] : memref<7x32xf32, #tpu.memory_space<vmem>>, vector<1x32xf32>
    %cst_11 = arith.constant 9.99999974E-6 : f32
    %20 = vector.broadcast %cst_11 : f32 to vector<1x32xf32>
    %21 = arith.addf %17, %20 : vector<1x32xf32>
    %22 = math.rsqrt %21 : vector<1x32xf32>
    %23 = vector.broadcast %22 : vector<1x32xf32> to vector<8x32xf32>
    %24 = arith.mulf %12, %23 : vector<8x32xf32>
    %25 = vector.broadcast %18 : vector<1x32xf32> to vector<8x32xf32>
    %26 = arith.mulf %24, %25 : vector<8x32xf32>
    %27 = vector.broadcast %19 : vector<1x32xf32> to vector<8x32xf32>
    %28 = arith.addf %26, %27 : vector<8x32xf32>
    %cst_12 = arith.constant 0.000000e+00 : f32
    %29 = vector.broadcast %cst_12 : f32 to vector<8x32xf32>
    %30 = arith.maximumf %28, %29 : vector<8x32xf32>
    %c16 = arith.constant 16 : index
    %c0_13 = arith.constant 0 : index
    %31 = vector.load %arg1[%c16, %c0_13] : memref<80x32xbf16, #tpu.memory_space<vmem>>, vector<32x32xbf16>
    %c1 = arith.constant 1 : index
    %c0_14 = arith.constant 0 : index
    %32 = vector.load %arg2[%c1, %c0_14] : memref<7x32xf32, #tpu.memory_space<vmem>>, vector<1x32xf32>
    %33 = arith.truncf %30 : vector<8x32xf32> to vector<8x32xbf16>
    %cst_15 = arith.constant dense<0.000000e+00> : vector<8x32xf32>
    %34 = tpu.matmul %33, %31, %cst_15 {dimension_numbers = #tpu.dot_dimension_numbers<[1], [0], [0], [1], [0, 0, 1, 1], [], []>} : vector<8x32xbf16>, vector<32x32xbf16>, vector<8x32xf32> -> vector<8x32xf32>
    %35 = vector.broadcast %32 : vector<1x32xf32> to vector<8x32xf32>
    %36 = arith.addf %34, %35 : vector<8x32xf32>
    %cst_16 = arith.constant dense<0.000000e+00> : vector<32xf32>
    %37 = vector.multi_reduction <add>, %36, %cst_16 [0] : vector<8x32xf32> to vector<32xf32>
    %38 = vector.shape_cast %37 : vector<32xf32> to vector<1x32xf32>
    %cst_17 = arith.constant 8.000000e+00 : f32
    %39 = vector.broadcast %cst_17 : f32 to vector<1x32xf32>
    %40 = arith.divf %38, %39 : vector<1x32xf32>
    %41 = vector.broadcast %40 : vector<1x32xf32> to vector<8x32xf32>
    %42 = arith.subf %36, %41 : vector<8x32xf32>
    %43 = arith.mulf %42, %42 : vector<8x32xf32>
    %cst_18 = arith.constant dense<0.000000e+00> : vector<32xf32>
    %44 = vector.multi_reduction <add>, %43, %cst_18 [0] : vector<8x32xf32> to vector<32xf32>
    %45 = vector.shape_cast %44 : vector<32xf32> to vector<1x32xf32>
    %cst_19 = arith.constant 8.000000e+00 : f32
    %46 = vector.broadcast %cst_19 : f32 to vector<1x32xf32>
    %47 = arith.divf %45, %46 : vector<1x32xf32>
    %c4 = arith.constant 4 : index
    %c0_20 = arith.constant 0 : index
    %48 = vector.load %arg2[%c4, %c0_20] : memref<7x32xf32, #tpu.memory_space<vmem>>, vector<1x32xf32>
    %c6 = arith.constant 6 : index
    %c0_21 = arith.constant 0 : index
    %49 = vector.load %arg2[%c6, %c0_21] : memref<7x32xf32, #tpu.memory_space<vmem>>, vector<1x32xf32>
    %cst_22 = arith.constant 9.99999974E-6 : f32
    %50 = vector.broadcast %cst_22 : f32 to vector<1x32xf32>
    %51 = arith.addf %47, %50 : vector<1x32xf32>
    %52 = math.rsqrt %51 : vector<1x32xf32>
    %53 = vector.broadcast %52 : vector<1x32xf32> to vector<8x32xf32>
    %54 = arith.mulf %42, %53 : vector<8x32xf32>
    %55 = vector.broadcast %48 : vector<1x32xf32> to vector<8x32xf32>
    %56 = arith.mulf %54, %55 : vector<8x32xf32>
    %57 = vector.broadcast %49 : vector<1x32xf32> to vector<8x32xf32>
    %58 = arith.addf %56, %57 : vector<8x32xf32>
    %cst_23 = arith.constant 0.000000e+00 : f32
    %59 = vector.broadcast %cst_23 : f32 to vector<8x32xf32>
    %60 = arith.maximumf %58, %59 : vector<8x32xf32>
    %c48 = arith.constant 48 : index
    %c0_24 = arith.constant 0 : index
    %61 = vector.load %arg1[%c48, %c0_24] : memref<80x32xbf16, #tpu.memory_space<vmem>>, vector<32x8xbf16>
    %c2 = arith.constant 2 : index
    %c0_25 = arith.constant 0 : index
    %62 = vector.load %arg2[%c2, %c0_25] : memref<7x32xf32, #tpu.memory_space<vmem>>, vector<1x8xf32>
    %63 = arith.truncf %60 : vector<8x32xf32> to vector<8x32xbf16>
    %cst_26 = arith.constant dense<0.000000e+00> : vector<8x8xf32>
    %64 = tpu.matmul %63, %61, %cst_26 {dimension_numbers = #tpu.dot_dimension_numbers<[1], [0], [0], [1], [0, 0, 1, 1], [], []>} : vector<8x32xbf16>, vector<32x8xbf16>, vector<8x8xf32> -> vector<8x8xf32>
    %65 = vector.broadcast %62 : vector<1x8xf32> to vector<8x8xf32>
    %66 = arith.addf %64, %65 : vector<8x8xf32>
    %c0_27 = arith.constant 0 : index
    %c0_28 = arith.constant 0 : index
    %67 = vector.load %arg3[%c0_27, %c0_28] : memref<8x8xf32, #tpu.memory_space<vmem>>, vector<8x8xf32>
    tpu.vector_store %arg3[%c0_27, %c0_28], %66 {strides = array<i32>} : memref<8x8xf32, #tpu.memory_space<vmem>>, vector<8x8xf32>,
    return
  }
}

</mosaic_0001>

<bundles_post_ra>
// kernel: _lambda_.1
= control target key start
LH: loop header
LB: loop body
LE: loop exit
PB: predicated region body
PF: predicated region fallthrough
CT: control target
= control target key end

     0   :  { %v372_v1 = vmov 0.0   ;;  %vm31_vm0 = vcmask 130048   ;;  %vm373_vm1 = vmmov 0   ;;  %s452_s0 = inlined_call_operand.vmem [shape: f32[8,16], index: 0, kind: input, shape index: {}]   ;;  %s453_s1 = inlined_call_operand.vmem [shape: bf16[80,32], index: 1, kind: input, shape index: {}]   ;;  %s454_s2 = inlined_call_operand.vmem [shape: f32[7,32], index: 2, kind: input, shape index: {}]   ;;  %s455_s3 = inlined_call_operand.hbm [shape: f32[8,8], index: 3, kind: output, shape index: {}]  }
   0x1   :  { %v339_v0 = vld [vmem:[%s453_s1] sm:$0xff]   ;;  %314 = vmatprep.subr.bf16.mxu0 %v372_v1  ;;  %320 = vmatprep.subr.bf16.mxu1 %v372_v1 }
   0x2   :  { %v16_v2 = vld [vmem:[%s452_s0] sm:$0xff]  ;;  %315 = vmatpush3.bf16.msra.mxu0 %v339_v0  ;;  %316 = vmatprep.mubr.msk.bf16.mxu0 %vm373_vm1, %v372_v1 }
   0x3   :  { %v20_v3 = vpack.c.bf16 %v16_v2, %v16_v2  ;;  %324 = vmatprep.mubr.msk.bf16.mxu1 %vm373_vm1, %v372_v1  ;;  %328 = vmatprep.subr.bf16.mxu0 %v372_v1 }
   0x4   :  { %8 = vsyncpa [#allocation3], 0  ;;  %v340_v4 = vld [vmem:[%s453_s1 + $0x8] sm:$0xff]   ;;  %v341_v5 = vld [vmem:[%s453_s1 + $0x10] sm:$0xff]   ;;  %vm75_vm2 = vcmask 261120   ;;  %s374_s9 = smov [#allocation2]  }
   0x5   :  { %317 = vmatmul.mubr.msk.bf16.vlgmr.msra.gmra.mrb[0].mxu0 %vm31_vm0, %v20_v3  ;;  %321 = vmatpush3.bf16.msra.mxu1 %v340_v4  ;;  %v291_v6 = vld [vmem:[%s454_s2] ss:$0 sm:$0xff]  ;;  %v294_v32 = vld [vmem:[%s454_s2 + $0x3] ss:$0 sm:$0xff]  ;;  %v295_v34 = vld [vmem:[%s454_s2 + $0x5] ss:$0 sm:$0xff] }
   0x6   :  { %332 = vmatprep.mubr.msk.bf16.mxu0 %vm373_vm1, %v372_v1  ;;  %322 = vmatprep.subr.bf16.mxu1 %v372_v1  ;;  %v342_v39 = vld [vmem:[%s453_s1 + $0x18] sm:$0xff]   ;;  %v343_v40 = vld [vmem:[%s453_s1 + $0x20] sm:$0xff]   ;;  %s283_s10 = sshll.u32 %s374_s9, 4  ;;  %vm275_vm3 = vcmask 64512   ;;  %s284_s10 = int_to_ptr.vmem [resolvable:$true] %s283_s10 }
   0x7   :  { %329 = vmatpush3.bf16.msra.mxu0 %v342_v39  ;;  %v296_v41 = vld [vmem:[%s454_s2 + $0x1] ss:$0 sm:$0xff]  ;;  %v300_v3 = vld [vmem:[%s454_s2 + $0x4] ss:$0 sm:$0xff]  ;;  %s348_s11 = scalar_lea.vmem %s284_s10, 128  ;;  %p353_p1 = scmp.lt.s32.totalorder %s284_s10, %s284_s10 }
   0x8   :  { %330 = vmatprep.subr.bf16.mxu0 %v372_v1  ;;  %p349_p0 = scmp.ne.s32.totalorder %s284_s10, %s348_s11  ;;  %p354_p2 = scmp.lt.s32.totalorder %s348_s11, %s348_s11 }
   0x9   :  { %323 = vmatpush3.bf16.msra.mxu1 %v341_v5  ;;  %v301_v5 = vld [vmem:[%s454_s2 + $0x6] ss:$0 sm:$0xff] }
   0xa   :  { %p355_p3 = por %p354_p2, %p353_p1 }
   0xb   :  { %331 = vmatpush3.bf16.msra.mxu0 %v343_v40 }
   0xc   :  { %p356_p4 = pnand %p355_p3, %p349_p0 }
  0xd8   :  { %v69_v7 = vpop.f32.mrb[0].mxu0 }
  0xd9   :  { %v70_v8 = vadd.f32 %v291_v6, %v69_v7  ;;  %v318_v9 = vpop.f32.mrb[1].mxu0 }
  0xda   :  { %v72_v10 = vpop.f32.mrb[2].mxu0 }
  0xdb   :  { %v76_v11 = vsel %vm75_vm2, %v70_v8, 0.0  ;;  %v319_v12 = vpop.f32.mrb[3].mxu0  ;;  %v302_v10 = vld [vmem:[%s454_s2 + $0x2] ss:$0 sm:$0xff] }
  0xdc   :  { %v77_v13 = vrot.slane %v76_v11, 4 }
  0xde   :  { %v78_v14 = vadd.f32 %v77_v13, %v76_v11 }
  0xe0   :  { %v79_v15 = vrot.slane %v78_v14, 2 }
  0xe2   :  { %v80_v16 = vadd.f32 %v79_v15, %v78_v14 }
  0xe4   :  { %v81_v17 = vrot.slane %v80_v16, 1 }
  0xe6   :  { %v82_v18 = vadd.f32 %v81_v17, %v80_v16 }
  0xe8   :  { %v84_v19 = vmul.f32 0.125, %v82_v18 }
  0xea   :  { %v85_v20 = vsub.f32 %v70_v8, %v84_v19 }
  0xec   :  { %v86_v21 = vmul.f32 %v85_v20, %v85_v20 }
  0xee   :  { %v87_v22 = vsel %vm75_vm2, %v86_v21, 0.0 }
  0xef   :  { %v88_v23 = vrot.slane %v87_v22, 4 }
  0xf1   :  { %v89_v24 = vadd.f32 %v88_v23, %v87_v22 }
  0xf3   :  { %v90_v25 = vrot.slane %v89_v24, 2 }
  0xf5   :  { %v91_v26 = vadd.f32 %v90_v25, %v89_v24 }
  0xf7   :  { %v92_v27 = vrot.slane %v91_v26, 1 }
  0xf9   :  { %v93_v28 = vadd.f32 %v92_v27, %v91_v26 }
  0xfb   :  { %v94_v29 = vmul.f32 0.125, %v93_v28 }
  0xfd   :  { %v97_v30 = vadd.f32 1e-05, %v94_v29 }
  0xff   :  { %344 = vrsqrt.f32 %v97_v30 }
 0x109   :  { %v345_v31 = vpop.eup %344 }
 0x10a   :  { %v99_v33 = vmul.f32 %v345_v31, %v85_v20 }
 0x10c   :  { %v104_v35 = vmul.f32 %v294_v32, %v99_v33 }
 0x10e   :  { %v109_v36 = vadd.f32 %v295_v34, %v104_v35 }
 0x110   :  { %v110_v37 = vmax.f32 %v109_v36, 0.0 }
 0x112   :  { %v116_v38 = vpack.c.bf16 %v110_v37, %v110_v37 }
 0x114   :  { %325 = vmatmul.mubr.msk.bf16.vlgmr.msra.gmra.mrb[0].mxu1 %vm75_vm2, %v116_v38 }
 0x1e7   :  { %v170_v42 = vpop.f32.mrb[0].mxu1 }
 0x1e8   :  { %v171_v43 = vadd.f32 %v296_v41, %v170_v42  ;;  %v326_v44 = vpop.f32.mrb[1].mxu1 }
 0x1e9   :  { %v173_v45 = vpop.f32.mrb[2].mxu1 }
 0x1ea   :  { %v176_v46 = vsel %vm75_vm2, %v171_v43, 0.0  ;;  %v327_v47 = vpop.f32.mrb[3].mxu1 }
 0x1eb   :  { %v177_v48 = vrot.slane %v176_v46, 4 }
 0x1ed   :  { %v178_v49 = vadd.f32 %v177_v48, %v176_v46 }
 0x1ef   :  { %v179_v50 = vrot.slane %v178_v49, 2 }
 0x1f1   :  { %v180_v51 = vadd.f32 %v179_v50, %v178_v49 }
 0x1f3   :  { %v181_v52 = vrot.slane %v180_v51, 1 }
 0x1f5   :  { %v182_v53 = vadd.f32 %v181_v52, %v180_v51 }
 0x1f7   :  { %v183_v54 = vmul.f32 0.125, %v182_v53 }
 0x1f9   :  { %v184_v55 = vsub.f32 %v171_v43, %v183_v54 }
 0x1fb   :  { %v185_v56 = vmul.f32 %v184_v55, %v184_v55 }
 0x1fd   :  { %v186_v57 = vsel %vm75_vm2, %v185_v56, 0.0 }
 0x1fe   :  { %v187_v58 = vrot.slane %v186_v57, 4 }
 0x200   :  { %v188_v59 = vadd.f32 %v187_v58, %v186_v57 }
 0x202   :  { %v189_v60 = vrot.slane %v188_v59, 2 }
 0x204   :  { %v190_v61 = vadd.f32 %v189_v60, %v188_v59 }
 0x206   :  { %v191_v62 = vrot.slane %v190_v61, 1 }
 0x208   :  { %v192_v63 = vadd.f32 %v191_v62, %v190_v61 }
 0x20a   :  { %v193_v0 = vmul.f32 0.125, %v192_v63 }
 0x20c   :  { %v196_v1 = vadd.f32 1e-05, %v193_v0 }
 0x20e   :  { %346 = vrsqrt.f32 %v196_v1 }
 0x218   :  { %v347_v2 = vpop.eup %346 }
 0x219   :  { %v198_v4 = vmul.f32 %v347_v2, %v184_v55 }
 0x21b   :  { %v203_v6 = vmul.f32 %v300_v3, %v198_v4 }
 0x21d   :  { %v208_v7 = vadd.f32 %v301_v5, %v203_v6 }
 0x21f   :  { %v209_v8 = vmax.f32 %v208_v7, 0.0 }
 0x221   :  { %v215_v9 = vpack.c.bf16 %v209_v8, %v209_v8 }
 0x223   :  { %333 = vmatmul.mubr.msk.bf16.vlgmr.msra.gmra.mrb[4].mxu0 %vm75_vm2, %v215_v9 }
 0x2f6   :  { %v269_v11 = vpop.f32.mrb[4].mxu0 }
 0x2f7   :  { %v270_v12 = vadd.f32 %v302_v10, %v269_v11  ;;  %v334_v13 = vpop.f32.mrb[5].mxu0 }
 0x2f8   :  { %v272_v14 = vpop.f32.mrb[6].mxu0 }
 0x2f9   :  { %v335_v15 = vpop.f32.mrb[7].mxu0  ;;  %276 = vst.msk [vmem:[#allocation2] sm:$0xff] %vm275_vm3, %v270_v12 }
 0x2fa   :  { %359 = shalt.err (!%p356_p4)
}
 0x2fb   :  { %s360_s2 = scalar_lea.hbm %s455_s3, 128 }
 0x2fc   :  { %p361_p5 = scmp.ne.s32.totalorder %s455_s3, %s360_s2  ;;  %p364_p6 = scmp.lt.u32.totalorder %s360_s2, %s455_s3 }
 0x2fe   :  { %p366_p7 = pnand %p364_p6, %p361_p5 }
 0x300   :  { %369 = shalt.err (!%p366_p7)
}
 0x301   :  { %286 = dma.vmem_to_hbm [thread:$0]  %s284_s10, 128, %s455_s3, [#allocation3]  }
 0x302   :  { %370 = dma.done.wait [#allocation3], 128  }
 0x303   :  { %371 = vsyncadd [#allocation3], 4294967168 }
 0x304   :  { %290 = vsyncpa [#allocation3], 1 }

</bundles_post_ra>
